<compile_context>
chip_gen: v7x
topology: tpu7x:2x2x1
jax: 0.10.0
libtpu: 0.0.40
codegen_flags: <defaults>
</compile_context>

<pallas_src>
import jax
import jax.numpy as jnp
from jax import lax
from jax.experimental import pallas as pl
from jax.experimental.pallas import tpu as pltpu


def _round_up(x, m):
    return (x + m - 1) // m * m


def mlp_kernel(x_ref, w1_ref, b1_ref, w2_ref, b2_ref, w3_ref, b3_ref, o_ref):
    """One batch tile.

    x_ref : (tb, F)    -- native batch-major layout straight from HBM
    w1    : (20, F)    b1 : (20, 1)
    w2    : (10, 20)   b2 : (10, 1)
    w3    : (1, 10)    b3 : (1, 1)
    o_ref : (1, tb)    -- lane-dense output slab (batch on the 128-lane axis)
    """
    x = x_ref[...].astype(jnp.float32)          # no-op cast for f32 inputs

    # Layer 1: contract the feature (last) dim of BOTH operands so the result
    # is (20, tb) -- batch lands on lanes with no explicit transpose of x
    # (same trans-B MXU pattern as Q @ K^T in flash attention).
    h1 = lax.dot_general(w1_ref[...], x, (((1,), (1,)), ((), ())),
                         preferred_element_type=jnp.float32)
    h1 = jnp.maximum(h1 + b1_ref[...], 0.0)     # (20, tb)

    # Layer 2 + ReLU (standard matmul, batch stays on lanes).
    h2 = jnp.dot(w2_ref[...], h1, preferred_element_type=jnp.float32)
    h2 = jnp.maximum(h2 + b2_ref[...], 0.0)     # (10, tb)

    # Layer 3 (no activation).  10->1 is latency-only on the MXU.
    y = jnp.dot(w3_ref[...], h2, preferred_element_type=jnp.float32) + b3_ref[...]

    # Lane-dense, unmasked store of the whole (1, tb) slab.
    o_ref[...] = y.astype(o_ref.dtype)
    # (For bit-closer f32 parity with PyTorch, pass precision=lax.Precision.HIGHEST
    #  to the dots; the kernel is HBM-bound so the extra MXU passes are free.)


def mlp_forward(x, params, *, tile_b=16384):
    """x: (B, F) float32 (or bfloat16).  Returns (B, 1) float32 == MLP.forward."""
    w1, b1, w2, b2, w3, b3 = params
    B, F = x.shape
    assert w1.shape == (20, F)

    lane = 128
    cap = max(lane, (int(tile_b) // lane) * lane)

    # Adaptive batch tile: big enough to amortize the ~0.35us/step pipeline
    # overhead, sized from B so padding waste stays <= 127 rows per step
    # (never pad B up to a multiple of a huge tile).
    n_steps = pl.cdiv(B, cap)
    tb = min(cap, _round_up(pl.cdiv(B, n_steps), lane))
    grid_b = pl.cdiv(B, tb)
    b_out = grid_b * tb                     # padded output length; sliced below

    # Per-tile VMEM estimate (bytes): double-buffered x block (lanes padded to
    # 128), double-buffered (1, tb) output block (sublanes padded to 8), the
    # in-kernel f32 copy of the tile, h1/h2/y intermediates, plus slack.
    itemsize = jnp.dtype(x.dtype).itemsize
    x_blk = tb * _round_up(F, lane) * itemsize
    x_val = tb * _round_up(F, lane) * 4
    o_blk = 8 * tb * 4
    tmp = (24 + 16 + 8) * tb * 4
    vmem_bytes = 2 * x_blk + 2 * o_blk + x_val + 2 * tmp + (4 << 20)
    vmem_limit = int(min(max(vmem_bytes, 32 << 20), 100 << 20))
    # NOTE: on v5e/v6e (128 MiB VMEM) tile_b can be raised to 32K-64K for a bit
    # more per-step amortization; keep the default 16K on v7x (64 MiB VMEM).
    # TODO(synk): for tile_b >= 64K, chunk the per-tile compute with a
    # fori_loop over ~2-4K-lane slices to cap the h1/h2 temporaries; at the
    # default 16K tile they are only ~3 MiB so chunking is not needed.
    # TODO(synk): if xprof shows exposed DMA at step boundaries, add
    # pipeline_mode=pl.Buffered(3) on the x BlockSpec (secondary knob).

    flops = 2 * B * (F * 20 + 20 * 10 + 10 * 1)
    bytes_accessed = int(
        x.size * itemsize
        + b_out * 4
        + sum(int(p.size) * jnp.dtype(p.dtype).itemsize for p in params)
    )

    def resident(p):
        # Constant index_map -> DMA'd once, stays VMEM-resident across the grid.
        return pl.BlockSpec(p.shape, lambda i: (0, 0))

    out_t = pl.pallas_call(
        mlp_kernel,
        out_shape=jax.ShapeDtypeStruct((1, b_out), jnp.float32),
        grid=(grid_b,),
        in_specs=[
            pl.BlockSpec((tb, F), lambda i: (i, 0)),     # x tile, native layout
            resident(w1), resident(b1),
            resident(w2), resident(b2),
            resident(w3), resident(b3),
        ],
        out_specs=pl.BlockSpec((1, tb), lambda i: (0, i)),   # lane-dense slab
        compiler_params=pltpu.CompilerParams(
            dimension_semantics=("parallel",),    # megacore sharding on v7x
            vmem_limit_bytes=vmem_limit,
        ),
        cost_estimate=pl.CostEstimate(
            flops=flops, transcendentals=0, bytes_accessed=bytes_accessed),
    )(x, w1, b1, w2, b2, w3, b3)

    # Drop the (<= tb-1 row) tile padding; (1, B) -> (B, 1) is a free reshape.
    return out_t[:, :B].T


def init_params(key, input_size=10):
    """Matches the PyTorch module's init: N(0, 0.02) weights, zero biases.
    Weights kept in PyTorch (out_features, in_features) layout; biases (out, 1)."""
    k1, k2, k3 = jax.random.split(key, 3)
    w1 = 0.02 * jax.random.normal(k1, (20, input_size), dtype=jnp.float32)
    b1 = jnp.zeros((20, 1), dtype=jnp.float32)
    w2 = 0.02 * jax.random.normal(k2, (10, 20), dtype=jnp.float32)
    b2 = jnp.zeros((10, 1), dtype=jnp.float32)
    w3 = 0.02 * jax.random.normal(k3, (1, 10), dtype=jnp.float32)
    b3 = jnp.zeros((1, 1), dtype=jnp.float32)
    return (w1, b1, w2, b2, w3, b3)


def reference(x, params):
    w1, b1, w2, b2, w3, b3 = params
    h1 = jnp.maximum(x @ w1.T + b1.T, 0.0)
    h2 = jnp.maximum(h1 @ w2.T + b2.T, 0.0)
    return h2 @ w3.T + b3.T


if __name__ == "__main__":
    key = jax.random.PRNGKey(0)
    kx, kp = jax.random.split(key)

    input_size = 10
    params = init_params(kp, input_size)

    # Tiny batch: single (partial) tile, exercises the boundary-block path.
    x_small = jax.random.normal(kx, (8, input_size), dtype=jnp.float32)
    out_small = jax.block_until_ready(mlp_forward(x_small, params))
    assert out_small.shape == (8, 1)
    assert jnp.allclose(out_small, reference(x_small, params), atol=1e-5, rtol=1e-5)

    # Non-divisible batch with a small tile cap: multi-step pipelined grid
    # (3 steps of 896 rows), adaptive tile sizing and a partial last block.
    x_mid = jax.random.normal(jax.random.fold_in(kx, 1), (2500, input_size),
                              dtype=jnp.float32)
    out_mid = jax.block_until_ready(mlp_forward(x_mid, params, tile_b=1024))
    assert out_mid.shape == (2500, 1)
    assert jnp.allclose(out_mid, reference(x_mid, params), atol=1e-5, rtol=1e-5)

    # Default (large-tile) path: one 4096-row tile, no padding.
    x_big = jax.random.normal(jax.random.fold_in(kx, 2), (4096, input_size),
                              dtype=jnp.float32)
    out_big = jax.block_until_ready(mlp_forward(x_big, params))
    assert out_big.shape == (4096, 1)
    assert jnp.allclose(out_big, reference(x_big, params), atol=1e-5, rtol=1e-5)

    print("KERNEL_OK")
</pallas_src>

<mosaic_0001>
module attributes {stable_mosaic.version = 11 : i64} {
  func.func @mlp_kernel(%arg0: i32, %arg1: memref<128x10xf32, #tpu.memory_space<vmem>>, %arg2: memref<20x10xf32, #tpu.memory_space<vmem>>, %arg3: memref<20x1xf32, #tpu.memory_space<vmem>>, %arg4: memref<10x20xf32, #tpu.memory_space<vmem>>, %arg5: memref<10x1xf32, #tpu.memory_space<vmem>>, %arg6: memref<1x10xf32, #tpu.memory_space<vmem>>, %arg7: memref<1x1xf32, #tpu.memory_space<vmem>>, %arg8: memref<1x128xf32, #tpu.memory_space<vmem>>) attributes {dimension_semantics = [#tpu.dimension_semantics<parallel>], iteration_bounds = array<i64: 1>, scalar_prefetch = 0 : i64, scratch_operands = 0 : i64, tpu.core_type = #tpu.core_type<tc>, window_params = [{transform_indices = @transform_0, window_bounds = array<i64: 128, 10>}, {pipeline_mode = #tpu.pipeline_mode<synchronous>, transform_indices = @transform_1, window_bounds = array<i64: 20, 10>}, {pipeline_mode = #tpu.pipeline_mode<synchronous>, transform_indices = @transform_2, window_bounds = array<i64: 20, 1>}, {pipeline_mode = #tpu.pipeline_mode<synchronous>, transform_indices = @transform_3, window_bounds = array<i64: 10, 20>}, {pipeline_mode = #tpu.pipeline_mode<synchronous>, transform_indices = @transform_4, window_bounds = array<i64: 10, 1>}, {pipeline_mode = #tpu.pipeline_mode<synchronous>, transform_indices = @transform_5, window_bounds = array<i64: 1, 10>}, {pipeline_mode = #tpu.pipeline_mode<synchronous>, transform_indices = @transform_6, window_bounds = array<i64: 1, 1>}, {transform_indices = @transform_7, window_bounds = array<i64: 1, 128>}]} {
    %c0 = arith.constant 0 : index
    %c0_0 = arith.constant 0 : index
    %0 = vector.load %arg1[%c0, %c0_0] : memref<128x10xf32, #tpu.memory_space<vmem>>, vector<128x10xf32>
    %c0_1 = arith.constant 0 : index
    %c0_2 = arith.constant 0 : index
    %1 = vector.load %arg2[%c0_1, %c0_2] : memref<20x10xf32, #tpu.memory_space<vmem>>, vector<20x10xf32>
    %cst = arith.constant dense<0.000000e+00> : vector<20x128xf32>
    %2 = tpu.matmul %1, %0, %cst {dimension_numbers = #tpu.dot_dimension_numbers<[1], [1], [0], [0], [0, 0, 1, 0], [], []>} : vector<20x10xf32>, vector<128x10xf32>, vector<20x128xf32> -> vector<20x128xf32>
    %c0_3 = arith.constant 0 : index
    %c0_4 = arith.constant 0 : index
    %3 = vector.load %arg3[%c0_3, %c0_4] : memref<20x1xf32, #tpu.memory_space<vmem>>, vector<20x1xf32>
    %4 = vector.broadcast %3 : vector<20x1xf32> to vector<20x128xf32>
    %5 = arith.addf %2, %4 : vector<20x128xf32>
    %cst_5 = arith.constant 0.000000e+00 : f32
    %6 = vector.broadcast %cst_5 : f32 to vector<20x128xf32>
    %7 = arith.maximumf %5, %6 : vector<20x128xf32>
    %c0_6 = arith.constant 0 : index
    %c0_7 = arith.constant 0 : index
    %8 = vector.load %arg4[%c0_6, %c0_7] : memref<10x20xf32, #tpu.memory_space<vmem>>, vector<10x20xf32>
    %cst_8 = arith.constant dense<0.000000e+00> : vector<10x128xf32>
    %9 = tpu.matmul %8, %7, %cst_8 {dimension_numbers = #tpu.dot_dimension_numbers<[1], [0], [0], [1], [0, 0, 1, 1], [], []>} : vector<10x20xf32>, vector<20x128xf32>, vector<10x128xf32> -> vector<10x128xf32>
    %c0_9 = arith.constant 0 : index
    %c0_10 = arith.constant 0 : index
    %10 = vector.load %arg5[%c0_9, %c0_10] : memref<10x1xf32, #tpu.memory_space<vmem>>, vector<10x1xf32>
    %11 = vector.broadcast %10 : vector<10x1xf32> to vector<10x128xf32>
    %12 = arith.addf %9, %11 : vector<10x128xf32>
    %cst_11 = arith.constant 0.000000e+00 : f32
    %13 = vector.broadcast %cst_11 : f32 to vector<10x128xf32>
    %14 = arith.maximumf %12, %13 : vector<10x128xf32>
    %c0_12 = arith.constant 0 : index
    %c0_13 = arith.constant 0 : index
    %15 = vector.load %arg6[%c0_12, %c0_13] : memref<1x10xf32, #tpu.memory_space<vmem>>, vector<1x10xf32>
    %cst_14 = arith.constant dense<0.000000e+00> : vector<1x128xf32>
    %16 = tpu.matmul %15, %14, %cst_14 {dimension_numbers = #tpu.dot_dimension_numbers<[1], [0], [0], [1], [0, 0, 1, 1], [], []>} : vector<1x10xf32>, vector<10x128xf32>, vector<1x128xf32> -> vector<1x128xf32>
    %c0_15 = arith.constant 0 : index
    %c0_16 = arith.constant 0 : index
    %17 = vector.load %arg7[%c0_15, %c0_16] : memref<1x1xf32, #tpu.memory_space<vmem>>, vector<1x1xf32>
    %18 = vector.broadcast %17 : vector<1x1xf32> to vector<1x128xf32>
    %19 = arith.addf %16, %18 : vector<1x128xf32>
    %c0_17 = arith.constant 0 : index
    %c0_18 = arith.constant 0 : index
    %20 = vector.load %arg8[%c0_17, %c0_18] : memref<1x128xf32, #tpu.memory_space<vmem>>, vector<1x128xf32>
    tpu.vector_store %arg8[%c0_17, %c0_18], %19 {strides = array<i32>} : memref<1x128xf32, #tpu.memory_space<vmem>>, vector<1x128xf32>,
    return
  }
  func.func @transform_0(%arg0: i32) -> (i32, i32) {
    %c0_i32 = arith.constant 0 : i32
    %c0_i32_0 = arith.constant 0 : i32
    return %arg0, %c0_i32 : i32, i32
  }
  func.func @transform_1(%arg0: i32) -> (i32, i32) {
    %c0_i32 = arith.constant 0 : i32
    %c0_i32_0 = arith.constant 0 : i32
    %c0_i32_1 = arith.constant 0 : i32
    return %c0_i32, %c0_i32_0 : i32, i32
  }
  func.func @transform_2(%arg0: i32) -> (i32, i32) {
    %c0_i32 = arith.constant 0 : i32
    %c0_i32_0 = arith.constant 0 : i32
    %c0_i32_1 = arith.constant 0 : i32
    return %c0_i32, %c0_i32_0 : i32, i32
  }
  func.func @transform_3(%arg0: i32) -> (i32, i32) {
    %c0_i32 = arith.constant 0 : i32
    %c0_i32_0 = arith.constant 0 : i32
    %c0_i32_1 = arith.constant 0 : i32
    return %c0_i32, %c0_i32_0 : i32, i32
  }
  func.func @transform_4(%arg0: i32) -> (i32, i32) {
    %c0_i32 = arith.constant 0 : i32
    %c0_i32_0 = arith.constant 0 : i32
    %c0_i32_1 = arith.constant 0 : i32
    return %c0_i32, %c0_i32_0 : i32, i32
  }
  func.func @transform_5(%arg0: i32) -> (i32, i32) {
    %c0_i32 = arith.constant 0 : i32
    %c0_i32_0 = arith.constant 0 : i32
    %c0_i32_1 = arith.constant 0 : i32
    return %c0_i32, %c0_i32_0 : i32, i32
  }
  func.func @transform_6(%arg0: i32) -> (i32, i32) {
    %c0_i32 = arith.constant 0 : i32
    %c0_i32_0 = arith.constant 0 : i32
    %c0_i32_1 = arith.constant 0 : i32
    return %c0_i32, %c0_i32_0 : i32, i32
  }
  func.func @transform_7(%arg0: i32) -> (i32, i32) {
    %c0_i32 = arith.constant 0 : i32
    %c0_i32_0 = arith.constant 0 : i32
    return %c0_i32, %arg0 : i32, i32
  }
}

</mosaic_0001>

<bundles_post_ra>
// kernel: tpu_custom_call.1
= control target key start
LH: loop header
LB: loop body
LE: loop exit
PB: predicated region body
PF: predicated region fallthrough
CT: control target
= control target key end

     0   :  { %s779_s0 = inlined_call_operand.vmem [shape: f32[8,10], index: 0, kind: input, shape index: {}]   ;;  %s780_s1 = inlined_call_operand.vmem [shape: f32[20,10], index: 1, kind: input, shape index: {}]   ;;  %s781_s2 = inlined_call_operand.vmem [shape: f32[20,1], index: 2, kind: input, shape index: {}]   ;;  %s782_s3 = inlined_call_operand.vmem [shape: f32[10,20], index: 3, kind: input, shape index: {}]   ;;  %s783_s4 = inlined_call_operand.vmem [shape: f32[10,1], index: 4, kind: input, shape index: {}]   ;;  %s784_s5 = inlined_call_operand.vmem [shape: f32[1,10], index: 5, kind: input, shape index: {}]   ;;  %s785_s6 = inlined_call_operand.<no memory space> [shape: f32[1,1], index: 6, kind: input, shape index: {}]   ;;  %s786_s7 = inlined_call_operand.hbm [shape: f32[1,128], index: 7, kind: output, shape index: {}]  }
   0x1   :  { %v12_v0 = vstv %s785_s6 }
   0x2   :  { %13 = vst [vmem:[#allocation2] sm:$0x1] %v12_v0 }
   0x3   :  { %v29_v1 = vld [vmem:[%s779_s0] sm:$0xff]  ;;  %v30_v2 = vld [vmem:[%s779_s0 + $0x8] sm:$0xff]  ;;  %vm66_vm0 = vcmask 80896   ;;  %v592_v3 = vmov 0.0|0.0   ;;  %vm593_vm2 = vmmov 0   ;;  %v594_v6 = vmov 0.0  }
   0x4   :  { %520 = vmatprep.subr.bf16.mxu0 %v592_v3  ;;  %v521_v4 = vpack.c.bf16 %v30_v2, %v29_v1  ;;  %vm650_vm1 = vmpackc.low %vm66_vm0, %vm66_vm0  ;;  %495 = vmatprep.mubr.msk.f32.mxu0 %vm593_vm2, %v594_v6  ;;  %v595_v7 = vmov 0   ;;  %v31_v8 = vld [vmem:[%s779_s0 + $0x10] sm:$0xff]  ;;  %v32_v9 = vld [vmem:[%s779_s0 + $0x18] sm:$0xff] }
   0x5   :  { %566 = vset.pattern.permute.xlu0 %v595_v7  ;;  %567 = vset.pattern.permute.xlu1 %v595_v7  ;;  %v48_v10 = vld [vmem:[%s781_s2] sm:$0xff]  ;;  %v525_v11 = vpack.c.bf16 %v32_v9, %v31_v8  ;;  %v50_v12 = vld [vmem:[%s781_s2 + $0x10] sm:$0xf]  ;;  %v49_v13 = vld [vmem:[%s781_s2 + $0x8] sm:$0xff] }
   0x6   :  { %523 = vmatpush3.bf16.xpose.msk.msra.mxu0 %vm650_vm1, %v521_v4  ;;  %53 = vperm.xlu0 %566, %v48_v10  }
   0x7   :  { %524 = vmatprep.subr.bf16.mxu0 %v592_v3  ;;  %63 = vperm.xlu1 %567, %v50_v12  }
   0x8   :  { %14 = vsyncpa [#allocation4], 0  ;;  %v209_v14 = vld [vmem:[%s783_s4] sm:$0xff]  ;;  %v34_v16 = vld [vmem:[%s779_s0 + $0x28] sm:$0xff]  ;;  %vm221_vm3 = vcmask 162816   ;;  %vm228_vm4 = vcmask 1043456   ;;  %v316_v2 = vlaneseq }
   0x9   :  { %v33_v15 = vld [vmem:[%s779_s0 + $0x20] sm:$0xff]  ;;  %v210_v17 = vld [vmem:[%s783_s4 + $0x8] sm:$0x3]  ;;  %v35_v20 = vld [vmem:[%s779_s0 + $0x30] sm:$0xff]  ;;  %vm323_vm5 = vcmask 1041408   ;;  %vm596_vm6 = vmmov 1  }
   0xa   :  { %58 = vperm.xlu0 %566, %v49_v13   ;;  %v310_v18 = vld [vmem:[#allocation2] sm:$0x1]  ;;  %v529_v19 = vpack.c.bf16 %v34_v16, %v33_v15  ;;  %v36_v21 = vld [vmem:[%s779_s0 + $0x38] sm:$0xff]  ;;  %v38_v24 = vld [vmem:[%s779_s0 + $0x48] sm:$0xff]  ;;  %s597_s26 = smov [#allocation3]  }
   0xb   :  { %213 = vperm.xlu1 %567, %v209_v14   ;;  %v533_v22 = vpack.c.bf16 %v36_v21, %v35_v20  ;;  %v37_v23 = vld [vmem:[%s779_s0 + $0x40] sm:$0xff]  ;;  %v39_v26 = vld [vmem:[%s779_s0 + $0x50] sm:$0xff]  ;;  %v40_v27 = vld [vmem:[%s779_s0 + $0x58] sm:$0xff]  ;;  %s404_s4 = sshll.u32 %s597_s26, 4  ;;  %s405_s4 = int_to_ptr.vmem [resolvable:$true] %s404_s4 }
   0xc   :  { %v537_v25 = vpack.c.bf16 %v38_v24, %v37_v23  ;;  %v541_v28 = vpack.c.bf16 %v40_v27, %v39_v26  ;;  %v41_v29 = vld [vmem:[%s779_s0 + $0x60] sm:$0xff]  ;;  %v42_v30 = vld [vmem:[%s779_s0 + $0x68] sm:$0xff]  ;;  %v43_v32 = vld [vmem:[%s779_s0 + $0x70] sm:$0xff]  ;;  %s568_s27 = scalar_lea.vmem %s405_s4, 16  ;;  %s572_s28 = scalar_lea.vmem %s405_s4, 32 }
   0xd   :  { %v545_v31 = vpack.c.bf16 %v42_v30, %v41_v29  ;;  %v44_v33 = vld [vmem:[%s779_s0 + $0x78] sm:$0xff]  ;;  %v45_v35 = vld [vmem:[%s780_s1] sm:$0xff]  ;;  %v46_v36 = vld [vmem:[%s780_s1 + $0x8] sm:$0xff]  ;;  %p569_p0 = scmp.ne.s32.totalorder %s405_s4, %s568_s27  ;;  %p573_p1 = scmp.lt.s32.totalorder %s405_s4, %s405_s4 }
   0xe   :  { %527 = vmatpush3.bf16.xpose.msk.msra.mxu0 %vm650_vm1, %v525_v11  ;;  %218 = vperm.xlu0 %566, %v210_v17   ;;  %v549_v34 = vpack.c.bf16 %v44_v33, %v43_v32  ;;  %v47_v37 = vld [vmem:[%s780_s1 + $0x10] sm:$0xf]  ;;  %v207_v38 = vld [vmem:[%s782_s3] sm:$0xff]  ;;  %v208_v55 = vld [vmem:[%s782_s3 + $0x8] sm:$0x3]  ;;  %p574_p2 = scmp.lt.s32.totalorder %s572_s28, %s568_s27 }
   0xf   :  { %528 = vmatprep.subr.bf16.mxu0 %v592_v3  ;;  %313 = vperm.xlu1 %567, %v310_v18   ;;  %vm558_vm7 = vmpackc.low %vm323_vm5, %vm596_vm6  ;;  %v309_v1 = vld [vmem:[%s784_s5] sm:$0x1] }
  0x10   :  { %510 = vmatprep.mubr.msk.f32.mxu1 %vm221_vm3, %v207_v38  ;;  %p575_p3 = por %p574_p2, %p573_p1 }
  0x12   :  { %p576_p4 = pnand %p575_p3, %p569_p0 }
  0x16   :  { %531 = vmatpush3.bf16.xpose.msk.msra.mxu0 %vm650_vm1, %v529_v19 }
  0x17   :  { %532 = vmatprep.subr.bf16.mxu0 %v592_v3 }
  0x1e   :  { %535 = vmatpush3.bf16.xpose.msk.msra.mxu0 %vm650_vm1, %v533_v22 }
  0x1f   :  { %536 = vmatprep.subr.bf16.mxu0 %v592_v3 }
  0x26   :  { %539 = vmatpush3.bf16.xpose.msk.msra.mxu0 %vm650_vm1, %v537_v25 }
  0x27   :  { %540 = vmatprep.subr.bf16.mxu0 %v592_v3 }
  0x2e   :  { %543 = vmatpush3.bf16.xpose.msk.msra.mxu0 %vm650_vm1, %v541_v28 }
  0x2f   :  { %544 = vmatprep.subr.bf16.mxu0 %v592_v3 }
  0x36   :  { %547 = vmatpush3.bf16.xpose.msk.msra.mxu0 %vm650_vm1, %v545_v31 }
  0x37   :  { %548 = vmatprep.subr.bf16.mxu0 %v592_v3 }
  0x3e   :  { %551 = vmatpush3.bf16.xpose.msk.msra.mxu0 %vm650_vm1, %v549_v34 }
  0x45   :  { %496 = vmatmul.mubr.msk.f32.vlgmr.msra.gmra.mrb[0].mxu0 %vm66_vm0, %v45_v35 }
  0x46   :  { %498 = vmatprep.mubr.msk.f32.mxu0 %vm593_vm2, %v594_v6 }
  0x49   :  { %499 = vmatmul.mubr.msk.f32.gmra.mrb[2].mxu0 %vm66_vm0, %v46_v36 }
  0x4a   :  { %501 = vmatprep.mubr.msk.f32.mxu0 %vm593_vm2, %v594_v6 }
  0x4d   :  { %502 = vmatmul.mubr.msk.f32.gmra.mrb[4].mxu0 %vm66_vm0, %v47_v37 }
  0x85   :  { %v54_v39 = vpop.permute.xlu0 %53 }
  0x86   :  { %v64_v49 = vpop.permute.xlu1 %63 }
  0x89   :  { %v59_v43 = vpop.permute.xlu0 %58 }
  0x8a   :  { %v214_v58 = vpop.permute.xlu1 %213 }
  0x8d   :  { %v219_v56 = vpop.permute.xlu0 %218 }
  0x8e   :  { %v314_v5 = vpop.permute.xlu1 %313 }
 0x118   :  { %v190_v40 = vpop.f32.mrb[0].mxu0 }
 0x119   :  { %v497_v41 = vpop.f32.mrb[1].mxu0  ;;  %v191_v42 = vadd.f32 %v190_v40, %v54_v39 }
 0x11b   :  { %v204_v47 = vmax.f32 %v191_v42, 0.0 }
 0x11c   :  { %v195_v44 = vpop.f32.mrb[2].mxu0 }
 0x11d   :  { %v196_v45 = vadd.f32 %v195_v44, %v59_v43  ;;  %v500_v46 = vpop.f32.mrb[3].mxu0 }
 0x11f   :  { %v205_v48 = vmax.f32 %v196_v45, 0.0 }
 0x120   :  { %v200_v50 = vpop.f32.mrb[4].mxu0 }
 0x121   :  { %v201_v51 = vadd.f32 %v200_v50, %v64_v49  ;;  %v503_v52 = vpop.f32.mrb[5].mxu0  ;;  %v552_v53 = vpack.c.bf16 %v205_v48, %v204_v47 }
 0x123   :  { %v206_v54 = vmax.f32 %v201_v51, 0.0  ;;  %553 = vmatprep.subr.bf16.mxu1 %v552_v53 }
 0x124   :  { %555 = vmatpush3.bf16.msra.mxu1 %v552_v53 }
 0x125   :  { %508 = vmatprep.subr.msk.mxu1 %vm228_vm4, %v206_v54 }
 0x128   :  { %509 = vmatpush3.msk.msra.mxu1 %vm228_vm4, %v206_v54 }
 0x129   :  { %511 = vmatmul.mubr.msk.f32.vlgmr.msra.gmra.mrb[0].mxu1 %vm221_vm3, %v208_v55  ;;  %556 = vmatprep.subr.bf16.mxu1 %v592_v3  ;;  %v317_v3 = vshrl.u32 %v316_v2, 7 }
 0x12a   :  { %517 = vmatprep.mubr.msk.f32.mxu1 %vm593_vm2, %v594_v6 }
 0x12b   :  { %v318_v4 = vsub.s32 0, %v317_v3 }
 0x12d   :  { %v319_v6 = vrot.slane %v314_v5, %v318_v4 }
 0x1fc   :  { %v512_v57 = vpop.f32.mrb[0].mxu1 }
 0x1fd   :  { %v304_v59 = vadd.f32 %v512_v57, %v219_v56  ;;  %v298_v60 = vpop.f32.mrb[1].mxu1 }
 0x1fe   :  { %v299_v61 = vadd.f32 %v298_v60, %v214_v58 }
 0x1ff   :  { %v308_v62 = vmax.f32 %v304_v59, 0.0 }
 0x200   :  { %v307_v63 = vmax.f32 %v299_v61, 0.0 }
 0x202   :  { %v557_v0 = vpack.c.bf16 %v308_v62, %v307_v63 }
 0x204   :  { %559 = vmatpush3.bf16.msk.msra.mxu1 %vm558_vm7, %v557_v0 }
 0x207   :  { %518 = vmatmul.mubr.msk.f32.vlgmr.msra.gmra.mrb[2].mxu1 %vm66_vm0, %v309_v1 }
 0x2da   :  { %v393_v7 = vpop.f32.mrb[2].mxu1 }
 0x2db   :  { %v394_v8 = vadd.f32 %v393_v7, %v319_v6  ;;  %v519_v9 = vpop.f32.mrb[3].mxu1 }
 0x2dd   :  { %397 = vst [vmem:[#allocation3] sm:$0x1] %v394_v8 }
 0x2de   :  { %579 = shalt.err (!%p576_p4)
}
 0x2df   :  { %s580_s6 = scalar_lea.hbm %s786_s7, 16 }
 0x2e0   :  { %p581_p5 = scmp.ne.s32.totalorder %s786_s7, %s580_s6  ;;  %p584_p6 = scmp.lt.u32.totalorder %s580_s6, %s786_s7 }
 0x2e2   :  { %p586_p7 = pnand %p584_p6, %p581_p5 }
 0x2e4   :  { %589 = shalt.err (!%p586_p7)
}
 0x2e5   :  { %407 = dma.vmem_to_hbm [thread:$0]  %s405_s4, 16, %s786_s7, [#allocation4]  }
 0x2e6   :  { %590 = dma.done.wait [#allocation4], 16  }
 0x2e7   :  { %591 = vsyncadd [#allocation4], 4294967280 }
 0x2e8   :  { %411 = vsyncpa [#allocation4], 1 }

</bundles_post_ra>
